<compile_context>
chip_gen: v6e
topology: v6e:2x2x1
jax: 0.10.0
libtpu: 0.0.40
codegen_flags: <defaults>
</compile_context>

<pallas_src>
import jax
import jax.numpy as jnp
from jax.experimental import pallas as pl
from jax.experimental.pallas import tpu as pltpu


def _round_up(x, m):
    return -(-x // m) * m


def _make_logreg_kernel(f_total, tk, mask_k):
    """Builds the kernel. mask_k is a *static* flag: True iff F % tk != 0."""

    def kernel(x_ref, w_ref, b_ref, o_ref, acc_ref):
        # x_ref: (tm, tk) VMEM   w_ref: (1, tk) VMEM   b_ref: (1, 1) SMEM
        # o_ref: (1, 1, tm) VMEM (lane-dense row)      acc_ref: (1, tm) f32 VMEM scratch
        k = pl.program_id(1)

        @pl.when(k == 0)
        def _():
            acc_ref[...] = jnp.zeros_like(acc_ref)

        x = x_ref[...]
        w = w_ref[...]
        if mask_k:
            # Partial K tail: zero out lanes past F so garbage (possibly NaN) in the
            # clamped DMA region never reaches the accumulation.
            col = k * tk + jax.lax.broadcasted_iota(jnp.int32, (1, tk), 1)
            valid = col < f_total
            x = jnp.where(valid, x, 0.0)
            w = jnp.where(valid, w, 0.0)

        # logits_partial = w @ x^T  -> (1, tm): batch rows land on lanes.
        acc_ref[...] += jax.lax.dot_general(
            w,
            x,
            dimension_numbers=(((1,), (1,)), ((), ())),
            preferred_element_type=jnp.float32,
        )

        @pl.when(k == pl.num_programs(1) - 1)
        def _():
            o_ref[0] = jax.nn.sigmoid(acc_ref[...] + b_ref[0, 0]).astype(o_ref.dtype)

    return kernel


def _vmem_capacity_bytes():
    try:
        return int(pltpu.get_tpu_info().vmem_capacity_bytes)
    except Exception:
        return 64 * 1024 * 1024  # conservative (v7x per-core VMEM)


def _choose_tiles(M, F, itemsize):
    vmem_cap = _vmem_capacity_bytes()
    # Budget for the double-buffered x tile: ~half of physical VMEM
    # (32 MiB on v7x, 64 MiB on v5e/v6e), leaving room for w/out/acc + headroom.
    x_budget = vmem_cap // 2
    f_lanes = _round_up(F, 128)  # real VMEM footprint per row (lane padding)

    if 2 * 128 * f_lanes * itemsize <= x_budget:
        # Common case: whole feature dim fits in one block.
        tk, n_k = F, 1
        tm = x_budget // (2 * f_lanes * itemsize)
    else:
        # Very wide F: split the reduction over a second ("arbitrary") grid axis.
        tm = 512
        tk = max(128, (x_budget // (2 * tm * itemsize) // 128) * 128)
        tk = min(tk, f_lanes)
        n_k = pl.cdiv(F, tk)

    tm = max(128, (tm // 128) * 128)
    tm = min(tm, 16384)
    # v7x has 2 TensorCores; keep >= ~8 parallel grid steps for large batches,
    # but never shrink the tile below 512 rows just for that.
    tm = min(tm, max(512, _round_up(pl.cdiv(M, 8), 128)))
    # Don't pad tiny batches up to a huge tile.
    tm = min(tm, _round_up(M, 128))
    tm = max(tm, 128)
    return tm, tk, n_k, vmem_cap


def logistic_reg_forward(x, weight, bias, *, tm=None, tk=None):
    """y = sigmoid(x @ weight.T + bias)  ==  torch.sigmoid(nn.Linear(F, 1)(x)).

    x:      (M, F) float32
    weight: (1, F) float32  (PyTorch nn.Linear weight layout)
    bias:   (1,)   float32
    returns (M, 1) float32
    """
    M, F = x.shape
    assert weight.shape == (1, F)

    x = x.astype(jnp.float32)
    weight = weight.astype(jnp.float32)
    itemsize = jnp.dtype(jnp.float32).itemsize

    auto_tm, auto_tk, auto_nk, vmem_cap = _choose_tiles(M, F, itemsize)
    if tm is None:
        tm = auto_tm
    else:
        tm = max(128, _round_up(int(tm), 128))
    if tk is None:
        tk, n_k = auto_tk, auto_nk
    else:
        tk = int(tk)
        assert tk == F or tk % 128 == 0, "tk must equal F or be a multiple of 128"
        n_k = pl.cdiv(F, tk)

    n_m = pl.cdiv(M, tm)
    mask_k = (F % tk) != 0
    kernel = _make_logreg_kernel(F, tk, mask_k)

    b = jnp.asarray(bias, jnp.float32).reshape(1, 1)

    # VMEM accounting with lane/sublane padding (double-buffered inputs/outputs).
    lanes_k = _round_up(tk, 128)
    vmem_need = (
        2 * tm * lanes_k      # x tile (double-buffered)
        + 2 * 8 * lanes_k     # weight row (pads to 8 sublanes)
        + 2 * 8 * tm          # output row
        + 8 * tm              # accumulator scratch
    ) * itemsize
    vmem_limit = int(min(max(vmem_need + (8 << 20), 32 << 20), vmem_cap - (4 << 20)))

    out = pl.pallas_call(
        kernel,
        out_shape=jax.ShapeDtypeStruct((n_m, 1, tm), jnp.float32),
        grid_spec=pltpu.PrefetchScalarGridSpec(
            num_scalar_prefetch=0,
            grid=(n_m, n_k),  # reduction axis last
            in_specs=[
                pl.BlockSpec((tm, tk), lambda i, k: (i, k)),            # x tile
                pl.BlockSpec((1, tk), lambda i, k: (0, k)),             # weight row
                pl.BlockSpec(memory_space=pltpu.MemorySpace.SMEM),      # bias scalar
            ],
            out_specs=pl.BlockSpec((1, 1, tm), lambda i, k: (i, 0, 0)),  # lane-dense row
            scratch_shapes=[pltpu.VMEM((1, tm), jnp.float32)],
        ),
        compiler_params=pltpu.CompilerParams(
            dimension_semantics=("parallel", "arbitrary"),
            vmem_limit_bytes=vmem_limit,
        ),
        cost_estimate=pl.CostEstimate(
            flops=2 * M * F,
            transcendentals=M,
            bytes_accessed=(M * F + n_m * F + 1 + M) * itemsize,
        ),
    )(x, weight, b)

    # Rows past M in the last tile are garbage lanes; slice them off.
    return out.reshape(n_m * tm)[:M].reshape(M, 1)


if __name__ == "__main__":
    # Small deterministic setup matching the PyTorch module: batch=16, no_input_features=32.
    batch = 16
    no_input_features = 32

    key = jax.random.PRNGKey(0)
    kx, kw, kb = jax.random.split(key, 3)

    x = jax.random.normal(kx, (batch, no_input_features), dtype=jnp.float32)

    # Deterministic init mimicking torch.nn.Linear: U(-1/sqrt(fan_in), 1/sqrt(fan_in)).
    bound = 1.0 / (no_input_features ** 0.5)
    w = jax.random.uniform(
        kw, (1, no_input_features), minval=-bound, maxval=bound, dtype=jnp.float32
    )
    b = jax.random.uniform(kb, (1,), minval=-bound, maxval=bound, dtype=jnp.float32)

    y = jax.block_until_ready(logistic_reg_forward(x, w, b))
    y_ref = jax.nn.sigmoid(x @ w.T + b)
    assert y.shape == (batch, 1)
    assert jnp.allclose(y, y_ref, atol=1e-5, rtol=1e-5)

    # Ragged batch (partial last M block, no HBM pad copy).
    x2 = jax.random.normal(jax.random.PRNGKey(1), (50, no_input_features), dtype=jnp.float32)
    y2 = jax.block_until_ready(logistic_reg_forward(x2, w, b))
    y2_ref = jax.nn.sigmoid(x2 @ w.T + b)
    assert y2.shape == (50, 1)
    assert jnp.allclose(y2, y2_ref, atol=1e-5, rtol=1e-5)

    # Exercise the wide-F (K-split + ragged-K mask) path with a forced small tk.
    F3 = 200
    x3 = jax.random.normal(jax.random.PRNGKey(2), (50, F3), dtype=jnp.float32)
    w3 = jax.random.uniform(
        jax.random.PRNGKey(3), (1, F3), minval=-0.1, maxval=0.1, dtype=jnp.float32
    )
    y3 = jax.block_until_ready(logistic_reg_forward(x3, w3, b, tk=128))
    y3_ref = jax.nn.sigmoid(x3 @ w3.T + b)
    assert y3.shape == (50, 1)
    assert jnp.allclose(y3, y3_ref, atol=1e-5, rtol=1e-5)

    print("KERNEL_OK")
</pallas_src>

<mosaic_0001>
module attributes {stable_mosaic.version = 11 : i64} {
  func.func @kernel(%arg0: i32, %arg1: i32, %arg2: memref<128x32xf32, #tpu.memory_space<vmem>>, %arg3: memref<1x32xf32, #tpu.memory_space<vmem>>, %arg4: memref<1x1xf32, #tpu.memory_space<smem>>, %arg5: memref<1x1x128xf32, #tpu.memory_space<vmem>>, %arg6: memref<1x128xf32, #tpu.memory_space<vmem>>) attributes {dimension_semantics = [#tpu.dimension_semantics<parallel>, #tpu.dimension_semantics<arbitrary>], iteration_bounds = array<i64: 1, 1>, scalar_prefetch = 0 : i64, scratch_operands = 1 : i64, tpu.core_type = #tpu.core_type<tc>, window_params = [{transform_indices = @transform_0, window_bounds = array<i64: 128, 32>}, {transform_indices = @transform_1, window_bounds = array<i64: 1, 32>}, {transform_indices = @transform_2, window_bounds = array<i64: 1, 1>}, {transform_indices = @transform_3, window_bounds = array<i64: 1, 1, 128>}]} {
    %c0_i32 = arith.constant 0 : i32
    %0 = arith.cmpi eq, %arg1, %c0_i32 : i32
    %1 = arith.extui %0 : i1 to i32
    %c0_i32_0 = arith.constant 0 : i32
    %2 = arith.cmpi ne, %1, %c0_i32_0 : i32
    scf.if %2 {
      %cst_10 = arith.constant 0.000000e+00 : f32
      %12 = vector.broadcast %cst_10 : f32 to vector<1x128xf32>
      %c0_11 = arith.constant 0 : index
      %c0_12 = arith.constant 0 : index
      %13 = vector.load %arg6[%c0_11, %c0_12] : memref<1x128xf32, #tpu.memory_space<vmem>>, vector<1x128xf32>
      tpu.vector_store %arg6[%c0_11, %c0_12], %12 {strides = array<i32>} : memref<1x128xf32, #tpu.memory_space<vmem>>, vector<1x128xf32>,
    } else {
    }
    %c0 = arith.constant 0 : index
    %c0_1 = arith.constant 0 : index
    %3 = vector.load %arg2[%c0, %c0_1] : memref<128x32xf32, #tpu.memory_space<vmem>>, vector<128x32xf32>
    %c0_2 = arith.constant 0 : index
    %c0_3 = arith.constant 0 : index
    %4 = vector.load %arg3[%c0_2, %c0_3] : memref<1x32xf32, #tpu.memory_space<vmem>>, vector<1x32xf32>
    %c0_4 = arith.constant 0 : index
    %c0_5 = arith.constant 0 : index
    %5 = vector.load %arg6[%c0_4, %c0_5] : memref<1x128xf32, #tpu.memory_space<vmem>>, vector<1x128xf32>
    %cst = arith.constant dense<0.000000e+00> : vector<1x128xf32>
    %6 = tpu.matmul %4, %3, %cst {dimension_numbers = #tpu.dot_dimension_numbers<[1], [1], [0], [0], [0, 0, 1, 0], [], []>} : vector<1x32xf32>, vector<128x32xf32>, vector<1x128xf32> -> vector<1x128xf32>
    %7 = arith.addf %5, %6 : vector<1x128xf32>
    %c0_6 = arith.constant 0 : index
    %c0_7 = arith.constant 0 : index
    %8 = vector.load %arg6[%c0_6, %c0_7] : memref<1x128xf32, #tpu.memory_space<vmem>>, vector<1x128xf32>
    tpu.vector_store %arg6[%c0_6, %c0_7], %7 {strides = array<i32>} : memref<1x128xf32, #tpu.memory_space<vmem>>, vector<1x128xf32>,
    %c0_i32_8 = arith.constant 0 : i32
    %9 = arith.cmpi eq, %arg1, %c0_i32_8 : i32
    %10 = arith.extui %9 : i1 to i32
    %c0_i32_9 = arith.constant 0 : i32
    %11 = arith.cmpi ne, %10, %c0_i32_9 : i32
    scf.if %11 {
      %c0_10 = arith.constant 0 : index
      %c0_11 = arith.constant 0 : index
      %12 = vector.load %arg6[%c0_10, %c0_11] : memref<1x128xf32, #tpu.memory_space<vmem>>, vector<1x128xf32>
      %c0_12 = arith.constant 0 : index
      %c0_13 = arith.constant 0 : index
      %13 = memref.load %arg4[%c0_12, %c0_13] : memref<1x1xf32, #tpu.memory_space<smem>>
      %14 = vector.broadcast %13 : f32 to vector<1x128xf32>
      %15 = arith.addf %12, %14 : vector<1x128xf32>
      %16 = arith.negf %15 : vector<1x128xf32>
      %17 = math.exp %16 : vector<1x128xf32>
      %cst_14 = arith.constant 1.000000e+00 : f32
      %18 = vector.broadcast %cst_14 : f32 to vector<1x128xf32>
      %19 = arith.addf %18, %17 : vector<1x128xf32>
      %20 = arith.divf %18, %19 : vector<1x128xf32>
      %c0_15 = arith.constant 0 : index
      %c0_16 = arith.constant 0 : index
      %c0_17 = arith.constant 0 : index
      %21 = vector.load %arg5[%c0_15, %c0_16, %c0_17] : memref<1x1x128xf32, #tpu.memory_space<vmem>>, vector<1x1x128xf32>
      %22 = vector.shape_cast %21 : vector<1x1x128xf32> to vector<1x128xf32>
      %23 = vector.shape_cast %20 : vector<1x128xf32> to vector<1x1x128xf32>
      tpu.vector_store %arg5[%c0_15, %c0_16, %c0_17], %23 {strides = array<i32>} : memref<1x1x128xf32, #tpu.memory_space<vmem>>, vector<1x1x128xf32>,
    } else {
    }
    return
  }
  func.func @transform_0(%arg0: i32, %arg1: i32) -> (i32, i32) {
    %c0_i32 = arith.constant 0 : i32
    return %arg0, %arg1 : i32, i32
  }
  func.func @transform_1(%arg0: i32, %arg1: i32) -> (i32, i32) {
    %c0_i32 = arith.constant 0 : i32
    %c0_i32_0 = arith.constant 0 : i32
    return %c0_i32, %arg1 : i32, i32
  }
  func.func @transform_2(%arg0: i32, %arg1: i32) -> (i32, i32) {
    %c0_i32 = arith.constant 0 : i32
    %c0_i32_0 = arith.constant 0 : i32
    %c0_i32_1 = arith.constant 0 : i32
    return %c0_i32, %c0_i32_0 : i32, i32
  }
  func.func @transform_3(%arg0: i32, %arg1: i32) -> (i32, i32, i32) {
    %c0_i32 = arith.constant 0 : i32
    %c0_i32_0 = arith.constant 0 : i32
    %c0_i32_1 = arith.constant 0 : i32
    return %arg0, %c0_i32, %c0_i32_0 : i32, i32, i32
  }
}

</mosaic_0001>

<bundles_post_ra>
// kernel: tpu_custom_call.1
= control target key start
LH: loop header
LB: loop body
LE: loop exit
PB: predicated region body
PF: predicated region fallthrough
CT: control target
= control target key end

     0   :  { %9 = vsyncpa [#allocation5], 0  ;;  %s385_s0 = inlined_call_operand.hbm [shape: f32[16,32], index: 0, kind: input, shape index: {}]   ;;  %s386_s1 = inlined_call_operand.vmem [shape: f32[1,32], index: 1, kind: input, shape index: {}]   ;;  %s387_s2 = inlined_call_operand.<no memory space> [shape: f32[1,1], index: 2, kind: input, shape index: {}]   ;;  %s388_s3 = inlined_call_operand.hbm [shape: f32[1,1,128], index: 3, kind: output, shape index: {}]  }
   0x1   :  { %10 = vsyncpa [#allocation6], 0 }
   0x2   :  { %15 = vsyncadd [#allocation5], 1792  ;;  %s330_s12 = smov [#allocation4]  }
   0x3   :  { %s16_s13 = sshll.u32 %s330_s12, 4  ;;  %s17_s13 = int_to_ptr.vmem [resolvable:$true] %s16_s13 }
   0x4   :  { %s294_s14 = scalar_lea.vmem %s17_s13, 256  ;;  %s298_s15 = scalar_lea.vmem %s17_s13, 2048 }
   0x5   :  { %p295_p0 = scmp.ne.s32.totalorder %s17_s13, %s294_s14  ;;  %p299_p1 = scmp.lt.s32.totalorder %s17_s13, %s17_s13 }
   0x6   :  { %p300_p2 = scmp.lt.s32.totalorder %s298_s15, %s294_s14 }
   0x8   :  { %p301_p3 = por %p300_p2, %p299_p1 }
   0xa   :  { %p302_p4 = pnand %p301_p3, %p295_p0 }
   0xc   :  { %305 = shalt.err (!%p302_p4)
}
   0xd   :  { %s331_s16 = smov 128   ;;  %s332_s17 = smov 8  }
   0xe   :  { %22 = dma.hbm_to_vmem [thread:$0]  %s385_s0, 256, %s17_s13, [#allocation5], %s331_s16, %s331_s16, %s332_s17  }
   0xf   :  { %326 = dma.done.wait [#allocation5], 2048  }
  0x10   :  { %327 = vsyncadd [#allocation5], 4294965248  ;;  %v333_v0 = vmov 0.0   ;;  %vm334_vm0 = vmmov 0   ;;  %vm53_vm1 = vcmask 261120   ;;  %v50_v1 = vld [vmem:[#allocation4 + $0x78] sm:$0xff]  ;;  %v182_v22 = vstv %s387_s2 }
  0x11   :  { %241 = vmatprep.subr.mxu0 %v333_v0  ;;  %34 = vst [vmem:[#allocation2] sm:$0x1] %v333_v0  ;;  %273 = vmatprep.mubr.msk.f32.mxu0 %vm334_vm0, %v333_v0  ;;  %v49_v2 = vld [vmem:[#allocation4 + $0x70] sm:$0xff]  ;;  %v48_v3 = vld [vmem:[#allocation4 + $0x68] sm:$0xff]  ;;  %v47_v4 = vld [vmem:[#allocation4 + $0x60] sm:$0xff]  ;;  %s335_s23 = smov [#allocation7]  }
  0x12   :  { %242 = vmatpush3.xpose.msk.msra.mxu0 %vm53_vm1, %v50_v1  ;;  %v46_v5 = vld [vmem:[#allocation4 + $0x58] sm:$0xff]  ;;  %v45_v6 = vld [vmem:[#allocation4 + $0x50] sm:$0xff]  ;;  %v44_v7 = vld [vmem:[#allocation4 + $0x48] sm:$0xff] }
  0x13   :  { %243 = vmatprep.subr.mxu0 %v333_v0  ;;  %v43_v8 = vld [vmem:[#allocation4 + $0x40] sm:$0xff]  ;;  %v42_v9 = vld [vmem:[#allocation4 + $0x38] sm:$0xff]  ;;  %v41_v10 = vld [vmem:[#allocation4 + $0x30] sm:$0xff] }
  0x14   :  { %v40_v11 = vld [vmem:[#allocation4 + $0x28] sm:$0xff]  ;;  %v39_v12 = vld [vmem:[#allocation4 + $0x20] sm:$0xff]  ;;  %v38_v13 = vld [vmem:[#allocation4 + $0x18] sm:$0xff] }
  0x15   :  { %v37_v14 = vld [vmem:[#allocation4 + $0x10] sm:$0xff]  ;;  %v36_v15 = vld [vmem:[#allocation4 + $0x8] sm:$0xff]  ;;  %v35_v16 = vld [vmem:[#allocation4] sm:$0xff] }
  0x16   :  { %244 = vmatpush3.xpose.msk.msra.mxu0 %vm53_vm1, %v49_v2  ;;  %v51_v17 = vld [vmem:[%s386_s1] sm:$0x1]  ;;  %s197_s1 = sshll.u32 %s335_s23, 4  ;;  %s198_s1 = int_to_ptr.vmem [resolvable:$true] %s197_s1 }
  0x17   :  { %245 = vmatprep.subr.mxu0 %v333_v0  ;;  %s306_s24 = scalar_lea.vmem %s198_s1, 16  ;;  %s310_s25 = scalar_lea.vmem %s198_s1, 32 }
  0x18   :  { %v52_v18 = vld [vmem:[#allocation2] sm:$0x1]  ;;  %p307_p5 = scmp.ne.s32.totalorder %s198_s1, %s306_s24  ;;  %p311_p6 = scmp.lt.s32.totalorder %s198_s1, %s198_s1 }
  0x19   :  { %p312_p7 = scmp.lt.s32.totalorder %s310_s25, %s306_s24 }
  0x1a   :  { %246 = vmatpush3.xpose.msk.msra.mxu0 %vm53_vm1, %v48_v3 }
  0x1b   :  { %247 = vmatprep.subr.mxu0 %v333_v0  ;;  %p313_p8 = por %p312_p7, %p311_p6 }
  0x1d   :  { %p314_p9 = pnand %p313_p8, %p307_p5 }
  0x1e   :  { %248 = vmatpush3.xpose.msk.msra.mxu0 %vm53_vm1, %v47_v4 }
  0x1f   :  { %249 = vmatprep.subr.mxu0 %v333_v0 }
  0x22   :  { %250 = vmatpush3.xpose.msk.msra.mxu0 %vm53_vm1, %v46_v5 }
  0x23   :  { %251 = vmatprep.subr.mxu0 %v333_v0 }
  0x26   :  { %252 = vmatpush3.xpose.msk.msra.mxu0 %vm53_vm1, %v45_v6 }
  0x27   :  { %253 = vmatprep.subr.mxu0 %v333_v0 }
  0x2a   :  { %254 = vmatpush3.xpose.msk.msra.mxu0 %vm53_vm1, %v44_v7 }
  0x2b   :  { %255 = vmatprep.subr.mxu0 %v333_v0 }
  0x2e   :  { %256 = vmatpush3.xpose.msk.msra.mxu0 %vm53_vm1, %v43_v8 }
  0x2f   :  { %257 = vmatprep.subr.mxu0 %v333_v0 }
  0x32   :  { %258 = vmatpush3.xpose.msk.msra.mxu0 %vm53_vm1, %v42_v9 }
  0x33   :  { %259 = vmatprep.subr.mxu0 %v333_v0 }
  0x36   :  { %260 = vmatpush3.xpose.msk.msra.mxu0 %vm53_vm1, %v41_v10 }
  0x37   :  { %261 = vmatprep.subr.mxu0 %v333_v0 }
  0x3a   :  { %262 = vmatpush3.xpose.msk.msra.mxu0 %vm53_vm1, %v40_v11 }
  0x3b   :  { %263 = vmatprep.subr.mxu0 %v333_v0 }
  0x3e   :  { %264 = vmatpush3.xpose.msk.msra.mxu0 %vm53_vm1, %v39_v12 }
  0x3f   :  { %265 = vmatprep.subr.mxu0 %v333_v0 }
  0x42   :  { %266 = vmatpush3.xpose.msk.msra.mxu0 %vm53_vm1, %v38_v13 }
  0x43   :  { %267 = vmatprep.subr.mxu0 %v333_v0 }
  0x46   :  { %268 = vmatpush3.xpose.msk.msra.mxu0 %vm53_vm1, %v37_v14 }
  0x47   :  { %269 = vmatprep.subr.mxu0 %v333_v0 }
  0x4a   :  { %270 = vmatpush3.xpose.msk.msra.mxu0 %vm53_vm1, %v36_v15 }
  0x4b   :  { %271 = vmatprep.subr.mxu0 %v333_v0 }
  0x4e   :  { %272 = vmatpush3.xpose.msk.msra.mxu0 %vm53_vm1, %v35_v16 }
  0x51   :  { %274 = vmatmul.mubr.msk.f32.vlgmr.msra.gmra.mxu0 %vm53_vm1, %v51_v17 }
 0x111   :  { %v171_v19 = vpop.f32.mrf.mxu0 }
 0x112   :  { %v175_v20 = vadd.f32 %v171_v19, %v52_v18 }
 0x113   :  { %v275_v21 = vpop.f32.mrf.mxu0 }
 0x114   :  { %176 = vst [vmem:[#allocation2] sm:$0x1] %v175_v20 }
 0x11b   :  { %v180_v23 = vld [vmem:[#allocation2] sm:$0x1] }
 0x11c   :  { %v183_v24 = vadd.f32 %v182_v22, %v180_v23 }
 0x11e   :  { %v223_v25 = vmul.f32 -1.442695, %v183_v24 }
 0x120   :  { %282 = vpow2.f32 %v223_v25 }
 0x12d   :  { %v283_v26 = vpop.eup %282 }
 0x12e   :  { %v187_v27 = vadd.f32 1.0, %v283_v26 }
 0x130   :  { %284 = vrcp.f32 %v187_v27 }
 0x13d   :  { %v285_v28 = vpop.eup %284 }
 0x13e   :  { %190 = vst [vmem:[#allocation7] sm:$0x1] %v285_v28 }
 0x13f   :  { %317 = shalt.err (!%p314_p9)
}
 0x140   :  { %200 = dma.vmem_to_hbm [thread:$0]  %s198_s1, 16, %s388_s3, [#allocation6]  }
 0x141   :  { %328 = dma.done.wait [#allocation6], 16  }
 0x142   :  { %329 = vsyncadd [#allocation6], 4294967280 }
 0x143   :  { %204 = vsyncpa [#allocation5], 1 }
 0x144   :  { %205 = vsyncpa [#allocation6], 1 }

</bundles_post_ra>
